<compile_context>
chip_gen: v5e
topology: v5e:2x2
jax: 0.10.0
libtpu: 0.0.40
codegen_flags: <defaults>
</compile_context>

<pallas_src>
import jax
import jax.numpy as jnp
from jax.experimental import pallas as pl
from jax.experimental.pallas import tpu as pltpu


def _identity_kernel(x_ref, o_ref):
    # The entire "forward" of EmptyLayer: o = x
    o_ref[...] = x_ref[...]


_LANE = 128
_MAX_BLOCK_BYTES = 1 << 20  # 1 MiB per block; ~4 MiB live with in+out double-buffering


def _pick_width(n):
    """Widest lane-dense (multiple of 128) last dim that divides n."""
    for w in (8192, 4096, 2048, 1024, 512, 256, 128):
        if n % w == 0:
            return w
    return None


def _pick_tile_rows(rows, max_rows):
    """Largest divisor of `rows` that is a multiple of 8 and <= max_rows."""
    if rows <= max_rows:
        return rows  # block equals full extent -> always a legal block shape
    best = 0
    d = 1
    while d * d <= rows:
        if rows % d == 0:
            for cand in (d, rows // d):
                if cand <= max_rows and cand % 8 == 0 and cand > best:
                    best = cand
        d += 1
    # Fallback: single full-extent block (legal for any size).
    return best if best > 0 else rows


def _empty_layer_forward_impl(x):
    """Identity forward pass (EmptyLayer.forward)."""
    orig_shape = x.shape
    n = x.size
    if n == 0:
        return x

    width = _pick_width(n)
    if width is None:
        # Ragged size (not a multiple of 128): identity semantics are exact,
        # so the cheapest correct thing is to return x untouched rather than
        # pad/copy through HBM just to run a no-op kernel.
        return x

    rows = n // width
    itemsize = jnp.dtype(x.dtype).itemsize
    max_rows_per_block = max(8, _MAX_BLOCK_BYTES // (width * itemsize))
    tile_rows = _pick_tile_rows(rows, max_rows_per_block)
    grid_rows = rows // tile_rows

    slab = x.reshape(rows, width)  # pure reshape, no padding copies

    out = pl.pallas_call(
        _identity_kernel,
        out_shape=jax.ShapeDtypeStruct((rows, width), x.dtype),
        grid=(grid_rows,),
        in_specs=[pl.BlockSpec((tile_rows, width), lambda i: (i, 0))],
        out_specs=pl.BlockSpec((tile_rows, width), lambda i: (i, 0)),
        input_output_aliases={0: 0},  # output aliases input: no extra HBM pass
        compiler_params=pltpu.CompilerParams(
            dimension_semantics=("parallel",),
        ),
    )(slab)

    return out.reshape(orig_shape)


# jit so reshapes stay bitcasts and the input/output aliasing can take effect.
empty_layer_forward = jax.jit(_empty_layer_forward_impl)


if __name__ == "__main__":
    key = jax.random.PRNGKey(0)
    x = jax.random.normal(key, (2, 4, 16, 16), dtype=jnp.float32)  # NCHW

    y = empty_layer_forward(x)
    jax.block_until_ready(y)

    assert y.shape == x.shape and y.dtype == x.dtype
    assert bool(jnp.all(y == x))
    print("KERNEL_OK")
</pallas_src>

<mosaic_0001>
module attributes {stable_mosaic.version = 11 : i64} {
  func.func @_identity_kernel(%arg0: i32, %arg1: memref<1x2048xf32, #tpu.memory_space<vmem>>, %arg2: memref<1x2048xf32, #tpu.memory_space<vmem>>) attributes {dimension_semantics = [#tpu.dimension_semantics<parallel>], iteration_bounds = array<i64: 1>, scalar_prefetch = 0 : i64, scratch_operands = 0 : i64, tpu.core_type = #tpu.core_type<tc>, window_params = [{transform_indices = @transform_0, window_bounds = array<i64: 1, 2048>}, {transform_indices = @transform_1, window_bounds = array<i64: 1, 2048>}]} {
    %c0 = arith.constant 0 : index
    %c0_0 = arith.constant 0 : index
    %0 = vector.load %arg1[%c0, %c0_0] : memref<1x2048xf32, #tpu.memory_space<vmem>>, vector<1x2048xf32>
    %c0_1 = arith.constant 0 : index
    %c0_2 = arith.constant 0 : index
    %1 = vector.load %arg2[%c0_1, %c0_2] : memref<1x2048xf32, #tpu.memory_space<vmem>>, vector<1x2048xf32>
    tpu.vector_store %arg2[%c0_1, %c0_2], %0 {strides = array<i32>} : memref<1x2048xf32, #tpu.memory_space<vmem>>, vector<1x2048xf32>,
    return
  }
  func.func @transform_0(%arg0: i32) -> (i32, i32) {
    %c0_i32 = arith.constant 0 : i32
    %c0_i32_0 = arith.constant 0 : i32
    return %arg0, %c0_i32 : i32, i32
  }
  func.func @transform_1(%arg0: i32) -> (i32, i32) {
    %c0_i32 = arith.constant 0 : i32
    %c0_i32_0 = arith.constant 0 : i32
    return %arg0, %c0_i32 : i32, i32
  }
}

</mosaic_0001>

<bundles_post_ra>
// kernel: _empty_layer_forward_impl.1
= control target key start
LH: loop header
LB: loop body
LE: loop exit
PB: predicated region body
PF: predicated region fallthrough
CT: control target
= control target key end

     0   :  { %s38_s0 = inlined_call_operand.vmem [shape: f32[1,2048], index: 0, kind: input, shape index: {}, may-alias: {0,1}]   ;;  %s39_s1 = inlined_call_operand.vmem [shape: f32[1,2048], index: 1, kind: output, shape index: {}, may-alias: {0,1}]  }
   0x1   :  { %v8_v0 = vld [vmem:[%s38_s0] sm:$0xff]  ;;  %v9_v1 = vld [vmem:[%s38_s0 + $0x8] sm:$0xff] }
   0x2   :  { %10 = vst [vmem:[%s39_s1] sm:$0xff] %v8_v0 }
   0x3   :  { %11 = vst [vmem:[%s39_s1 + $0x8] sm:$0xff] %v9_v1 }

</bundles_post_ra>
